<compile_context>
chip_gen: v7x
topology: tpu7x:2x2x1
jax: 0.10.0
libtpu: 0.0.40
codegen_flags: <defaults>
</compile_context>

<pallas_src>
import functools

import jax
import jax.numpy as jnp
from jax.experimental import pallas as pl
from jax.experimental.pallas import tpu as pltpu

_LANE = 128
_BLOCK_BYTES = 2 * 1024 * 1024       # target input-block bytes per grid step
_VMEM_LIMIT = 48 * 1024 * 1024       # scoped VMEM limit (<= v7x physical 64 MiB)


def _pair(v):
    return tuple(v) if isinstance(v, (tuple, list)) else (v, v)


def _quadruple(v):
    return tuple(v) if isinstance(v, (tuple, list)) else (v, v, v, v)


def _separable_var(x, *, kh, kw, sh, sw, h_out, w_out, h_axis, w_axis):
    """Variance pooling of one VMEM block via separable shifted-slice sums."""
    x = x.astype(jnp.float32)
    x2 = x * x

    def shifted_sum(arrs, axis, k, s, n_out):
        outs = [None] * len(arrs)
        for d in range(k):                       # static unroll (k is small)
            idx = [slice(None)] * x.ndim
            idx[axis] = slice(d, d + s * (n_out - 1) + 1, s)
            idx = tuple(idx)
            for t, a in enumerate(arrs):
                sl = a[idx]
                outs[t] = sl if outs[t] is None else outs[t] + sl
        return outs

    # Sum along W first, then H: ~2*(kh+kw) adds instead of 2*kh*kw.
    s1, s2 = shifted_sum((x, x2), w_axis, kw, sw, w_out)
    a1, a2 = shifted_sum((s1, s2), h_axis, kh, sh, h_out)

    inv_area = 1.0 / float(kh * kw)
    m1 = a1 * inv_area
    m2 = a2 * inv_area
    return m2 - m1 * m1


def _var_pool_cl_kernel(x_ref, o_ref, *, kh, kw, sh, sw, h_out, w_out):
    # channels-last block: x_ref (Hp, Wp, Cb) -> o_ref (Hout, Wout, Cb).
    # Lane axis = channels: never shifted, never strided.
    v = _separable_var(x_ref[...], kh=kh, kw=kw, sh=sh, sw=sw,
                       h_out=h_out, w_out=w_out, h_axis=0, w_axis=1)
    o_ref[...] = v.astype(o_ref.dtype)


def _var_pool_nchw_kernel(x_ref, o_ref, *, kh, kw, sh, sw, h_out, w_out):
    # plane-batched block: x_ref (Bb, Hp, Wp) -> o_ref (Bb, Hout, Wout).
    # Lane axis = W (dense for large images).
    # TODO(synk): for sw > 1 the W window slice is lane-strided; pool at
    # stride 1 along W and subsample in the wrapper if that shows up in profiles.
    v = _separable_var(x_ref[...], kh=kh, kw=kw, sh=sh, sw=sw,
                       h_out=h_out, w_out=w_out, h_axis=1, w_axis=2)
    o_ref[...] = v.astype(o_ref.dtype)


class VariancePool2d:
    """JAX/Pallas port of the PyTorch VariancePool2d module (forward only)."""

    def __init__(self, kernel_size=3, stride=1, padding=0, same=False):
        self.kernel_size = kernel_size
        self.stride = stride
        self.padding = padding
        self.same = same
        self._k = _pair(kernel_size)
        self._s = _pair(stride)
        self._p = _quadruple(padding)

    def _padding(self, x):
        if self.same:
            ih, iw = x.shape[2:]
            if ih % self._s[0] == 0:
                ph = max(self._k[0] - self._s[0], 0)
            else:
                ph = max(self._k[0] - ih % self._s[0], 0)
            if iw % self._s[1] == 0:
                pw = max(self._k[1] - self._s[1], 0)
            else:
                pw = max(self._k[1] - iw % self._s[1], 0)
            p_l = pw // 2
            p_r = pw - p_l
            p_t = ph // 2
            p_b = ph - p_t
            return (p_l, p_r, p_t, p_b)
        return self._p

    def __call__(self, x):
        n, c, h, w = x.shape
        p_l, p_r, p_t, p_b = self._padding(x)
        if max(p_t, p_b) >= h or max(p_l, p_r) >= w:
            raise ValueError("reflect padding must be smaller than the spatial dims")
        # Reflect padding (torch F.pad mode='reflect') done in plain-JAX glue.
        if any(p > 0 for p in (p_l, p_r, p_t, p_b)):
            x = jnp.pad(x, ((0, 0), (0, 0), (p_t, p_b), (p_l, p_r)),
                        mode="reflect")

        kh, kw = self._k
        sh, sw = self._s
        hp, wp = x.shape[2], x.shape[3]
        h_out = (hp - kh) // sh + 1
        w_out = (wp - kw) // sw + 1
        nc = n * c
        itemsize = jnp.dtype(x.dtype).itemsize
        plane_bytes = hp * wp * itemsize

        cost = pl.CostEstimate(
            flops=3 * kh * kw * nc * h_out * w_out,
            transcendentals=0,
            bytes_accessed=itemsize * nc * (hp * wp + h_out * w_out))
        cparams = pltpu.CompilerParams(
            dimension_semantics=("parallel",),
            vmem_limit_bytes=_VMEM_LIMIT)

        xp = x.reshape(nc, hp, wp)

        # Channels-last wins when NC fills the 128-lane axis at least as well
        # as W and one full spatial plane x min(NC,128) channels fits budget.
        use_cl = (min(nc, _LANE) >= min(wp, _LANE)
                  and min(nc, _LANE) * plane_bytes <= _BLOCK_BYTES)

        if use_cl:
            if nc <= _LANE:
                c_blk = nc                              # == full last dim
            else:
                c_blk = max(_LANE,
                            (_BLOCK_BYTES // plane_bytes) // _LANE * _LANE)
                c_blk = min(c_blk, (nc // _LANE) * _LANE)
            grid = (pl.cdiv(nc, c_blk),)
            x_cl = jnp.transpose(xp, (1, 2, 0))         # (Hp, Wp, NC)
            kernel = functools.partial(_var_pool_cl_kernel, kh=kh, kw=kw,
                                       sh=sh, sw=sw, h_out=h_out, w_out=w_out)
            y = pl.pallas_call(
                kernel,
                out_shape=jax.ShapeDtypeStruct((h_out, w_out, nc), x.dtype),
                grid=grid,
                in_specs=[pl.BlockSpec((hp, wp, c_blk), lambda i: (0, 0, i))],
                out_specs=pl.BlockSpec((h_out, w_out, c_blk),
                                       lambda i: (0, 0, i)),
                compiler_params=cparams,
                cost_estimate=cost,
            )(x_cl)
            return jnp.transpose(y, (2, 0, 1)).reshape(n, c, h_out, w_out)

        # Plane-batched NCHW path: batch as many full planes as fit the budget.
        # TODO(synk): spatially tile with halos (manual DMA) if a single padded
        # plane ever exceeds the VMEM block budget.
        b_blk = int(max(1, min(nc, _BLOCK_BYTES // plane_bytes)))
        grid = (pl.cdiv(nc, b_blk),)
        kernel = functools.partial(_var_pool_nchw_kernel, kh=kh, kw=kw,
                                   sh=sh, sw=sw, h_out=h_out, w_out=w_out)
        y = pl.pallas_call(
            kernel,
            out_shape=jax.ShapeDtypeStruct((nc, h_out, w_out), x.dtype),
            grid=grid,
            in_specs=[pl.BlockSpec((b_blk, hp, wp), lambda i: (i, 0, 0))],
            out_specs=pl.BlockSpec((b_blk, h_out, w_out), lambda i: (i, 0, 0)),
            compiler_params=cparams,
            cost_estimate=cost,
        )(xp)
        return y.reshape(n, c, h_out, w_out)


def _reference(x, kernel_size=3, stride=1, padding=0, same=False):
    """Pure-JAX reference (same math, no Pallas)."""
    mod = VariancePool2d(kernel_size, stride, padding, same)
    p_l, p_r, p_t, p_b = mod._padding(x)
    if any(p > 0 for p in (p_l, p_r, p_t, p_b)):
        x = jnp.pad(x, ((0, 0), (0, 0), (p_t, p_b), (p_l, p_r)), mode="reflect")
    kh, kw = mod._k
    sh, sw = mod._s
    hp, wp = x.shape[2:]
    h_out = (hp - kh) // sh + 1
    w_out = (wp - kw) // sw + 1

    def pool(a):
        acc = jnp.zeros(a.shape[:2] + (h_out, w_out), jnp.float32)
        for di in range(kh):
            for dj in range(kw):
                acc = acc + a[:, :, di:di + sh * (h_out - 1) + 1:sh,
                              dj:dj + sw * (w_out - 1) + 1:sw]
        return acc / float(kh * kw)

    xf = x.astype(jnp.float32)
    return (pool(xf * xf) - pool(xf) ** 2).astype(x.dtype)


if __name__ == "__main__":
    key = jax.random.PRNGKey(0)
    k1, k2, k3 = jax.random.split(key, 3)

    # 1) Default config -> plane-batched NCHW path (W fills lanes >= NC).
    x1 = jax.random.normal(k1, (2, 4, 16, 16), dtype=jnp.float32)
    m1 = VariancePool2d(kernel_size=3, stride=1, padding=0, same=False)
    y1 = jax.block_until_ready(m1(x1))
    r1 = _reference(x1, 3, 1, 0, False)
    assert y1.shape == (2, 4, 14, 14), y1.shape
    assert jnp.allclose(y1, r1, atol=1e-5, rtol=1e-5), "mismatch (test 1)"

    # 2) Many channels + 'same' reflect padding -> channels-last (lane-dense) path.
    x2 = jax.random.normal(k2, (2, 64, 12, 12), dtype=jnp.float32)
    m2 = VariancePool2d(kernel_size=3, stride=1, padding=0, same=True)
    y2 = jax.block_until_ready(m2(x2))
    r2 = _reference(x2, 3, 1, 0, True)
    assert y2.shape == (2, 64, 12, 12), y2.shape
    assert jnp.allclose(y2, r2, atol=1e-5, rtol=1e-5), "mismatch (test 2)"

    # 3) Explicit symmetric padding=1, stride 1 -> NCHW path with padded input.
    x3 = jax.random.normal(k3, (1, 4, 16, 16), dtype=jnp.float32)
    m3 = VariancePool2d(kernel_size=3, stride=1, padding=1, same=False)
    y3 = jax.block_until_ready(m3(x3))
    r3 = _reference(x3, 3, 1, 1, False)
    assert y3.shape == (1, 4, 16, 16), y3.shape
    assert jnp.allclose(y3, r3, atol=1e-5, rtol=1e-5), "mismatch (test 3)"

    print("KERNEL_OK")
</pallas_src>

<mosaic_0001>
module attributes {stable_mosaic.version = 11 : i64} {
  func.func @_var_pool_nchw_kernel(%arg0: i32, %arg1: memref<8x16x16xf32, #tpu.memory_space<vmem>>, %arg2: memref<8x14x14xf32, #tpu.memory_space<vmem>>) attributes {dimension_semantics = [#tpu.dimension_semantics<parallel>], iteration_bounds = array<i64: 1>, scalar_prefetch = 0 : i64, scratch_operands = 0 : i64, tpu.core_type = #tpu.core_type<tc>, window_params = [{transform_indices = @transform_0, window_bounds = array<i64: 8, 16, 16>}, {transform_indices = @transform_1, window_bounds = array<i64: 8, 14, 14>}]} {
    %c0 = arith.constant 0 : index
    %c0_0 = arith.constant 0 : index
    %c0_1 = arith.constant 0 : index
    %0 = vector.load %arg1[%c0, %c0_0, %c0_1] : memref<8x16x16xf32, #tpu.memory_space<vmem>>, vector<8x16x16xf32>
    %1 = arith.mulf %0, %0 : vector<8x16x16xf32>
    %2 = vector.extract_strided_slice %0 {offsets = [0, 0, 0], sizes = [8, 16, 14], strides = [1, 1, 1]} : vector<8x16x16xf32> to vector<8x16x14xf32>
    %3 = vector.extract_strided_slice %1 {offsets = [0, 0, 0], sizes = [8, 16, 14], strides = [1, 1, 1]} : vector<8x16x16xf32> to vector<8x16x14xf32>
    %4 = vector.extract_strided_slice %0 {offsets = [0, 0, 1], sizes = [8, 16, 14], strides = [1, 1, 1]} : vector<8x16x16xf32> to vector<8x16x14xf32>
    %5 = arith.addf %2, %4 : vector<8x16x14xf32>
    %6 = vector.extract_strided_slice %1 {offsets = [0, 0, 1], sizes = [8, 16, 14], strides = [1, 1, 1]} : vector<8x16x16xf32> to vector<8x16x14xf32>
    %7 = arith.addf %3, %6 : vector<8x16x14xf32>
    %8 = vector.extract_strided_slice %0 {offsets = [0, 0, 2], sizes = [8, 16, 14], strides = [1, 1, 1]} : vector<8x16x16xf32> to vector<8x16x14xf32>
    %9 = arith.addf %5, %8 : vector<8x16x14xf32>
    %10 = vector.extract_strided_slice %1 {offsets = [0, 0, 2], sizes = [8, 16, 14], strides = [1, 1, 1]} : vector<8x16x16xf32> to vector<8x16x14xf32>
    %11 = arith.addf %7, %10 : vector<8x16x14xf32>
    %12 = vector.extract_strided_slice %9 {offsets = [0, 0, 0], sizes = [8, 14, 14], strides = [1, 1, 1]} : vector<8x16x14xf32> to vector<8x14x14xf32>
    %13 = vector.extract_strided_slice %11 {offsets = [0, 0, 0], sizes = [8, 14, 14], strides = [1, 1, 1]} : vector<8x16x14xf32> to vector<8x14x14xf32>
    %14 = vector.extract_strided_slice %9 {offsets = [0, 1, 0], sizes = [8, 14, 14], strides = [1, 1, 1]} : vector<8x16x14xf32> to vector<8x14x14xf32>
    %15 = arith.addf %12, %14 : vector<8x14x14xf32>
    %16 = vector.extract_strided_slice %11 {offsets = [0, 1, 0], sizes = [8, 14, 14], strides = [1, 1, 1]} : vector<8x16x14xf32> to vector<8x14x14xf32>
    %17 = arith.addf %13, %16 : vector<8x14x14xf32>
    %18 = vector.extract_strided_slice %9 {offsets = [0, 2, 0], sizes = [8, 14, 14], strides = [1, 1, 1]} : vector<8x16x14xf32> to vector<8x14x14xf32>
    %19 = arith.addf %15, %18 : vector<8x14x14xf32>
    %20 = vector.extract_strided_slice %11 {offsets = [0, 2, 0], sizes = [8, 14, 14], strides = [1, 1, 1]} : vector<8x16x14xf32> to vector<8x14x14xf32>
    %21 = arith.addf %17, %20 : vector<8x14x14xf32>
    %cst = arith.constant 0.111111112 : f32
    %22 = vector.broadcast %cst : f32 to vector<8x14x14xf32>
    %23 = arith.mulf %19, %22 : vector<8x14x14xf32>
    %cst_2 = arith.constant 0.111111112 : f32
    %24 = vector.broadcast %cst_2 : f32 to vector<8x14x14xf32>
    %25 = arith.mulf %21, %24 : vector<8x14x14xf32>
    %26 = arith.mulf %23, %23 : vector<8x14x14xf32>
    %27 = arith.subf %25, %26 : vector<8x14x14xf32>
    %c0_3 = arith.constant 0 : index
    %c0_4 = arith.constant 0 : index
    %c0_5 = arith.constant 0 : index
    %28 = vector.load %arg2[%c0_3, %c0_4, %c0_5] : memref<8x14x14xf32, #tpu.memory_space<vmem>>, vector<8x14x14xf32>
    tpu.vector_store %arg2[%c0_3, %c0_4, %c0_5], %27 {strides = array<i32>} : memref<8x14x14xf32, #tpu.memory_space<vmem>>, vector<8x14x14xf32>,
    return
  }
  func.func @transform_0(%arg0: i32) -> (i32, i32, i32) {
    %c0_i32 = arith.constant 0 : i32
    %c0_i32_0 = arith.constant 0 : i32
    %c0_i32_1 = arith.constant 0 : i32
    return %arg0, %c0_i32, %c0_i32_0 : i32, i32, i32
  }
  func.func @transform_1(%arg0: i32) -> (i32, i32, i32) {
    %c0_i32 = arith.constant 0 : i32
    %c0_i32_0 = arith.constant 0 : i32
    %c0_i32_1 = arith.constant 0 : i32
    return %arg0, %c0_i32, %c0_i32_0 : i32, i32, i32
  }
}

</mosaic_0001>

<bundles_post_ra>
// kernel: tpu_custom_call.1
= control target key start
LH: loop header
LB: loop body
LE: loop exit
PB: predicated region body
PF: predicated region fallthrough
CT: control target
= control target key end

     0   :  { %6 = vsyncpa [#allocation3], 0  ;;  %s716_s6 = smov [#allocation2]   ;;  %s1235_s0 = inlined_call_operand.hbm [shape: f32[8,16,16], index: 0, kind: input, shape index: {}]   ;;  %s1236_s1 = inlined_call_operand.vmem [shape: f32[8,14,14], index: 1, kind: output, shape index: {}]  }
   0x1   :  { %s12_s7 = sshll.u32 %s716_s6, 4  ;;  %s692_s10 = scalar_lea.hbm %s1235_s0, 2048  ;;  %s13_s7 = int_to_ptr.vmem [resolvable:$true] %s12_s7 }
   0x2   :  { %p693_p0 = scmp.ne.s32.totalorder %s1235_s0, %s692_s10  ;;  %p696_p1 = scmp.lt.u32.totalorder %s692_s10, %s1235_s0 }
   0x4   :  { %p698_p2 = pnand %p696_p1, %p693_p0 }
   0x6   :  { %701 = shalt.err (!%p698_p2)
}
   0x7   :  { %s702_s15 = scalar_lea.vmem %s13_s7, 2048  ;;  %p707_p4 = scmp.lt.s32.totalorder %s13_s7, %s13_s7 }
   0x8   :  { %p703_p3 = scmp.ne.s32.totalorder %s13_s7, %s702_s15  ;;  %p708_p5 = scmp.lt.s32.totalorder %s702_s15, %s702_s15 }
   0xa   :  { %p709_p6 = por %p708_p5, %p707_p4 }
   0xc   :  { %p710_p7 = pnand %p709_p6, %p703_p3 }
   0xe   :  { %713 = shalt.err (!%p710_p7)
}
   0xf   :  { %s717_s16 = smov 128   ;;  %s718_s17 = smov 8  }
  0x10   :  { %18 = dma.hbm_to_vmem [thread:$0]  %s1235_s0, 2048, %s13_s7, [#allocation3], %s717_s16, %s717_s16, %s718_s17  }
  0x11   :  { %714 = dma.done.wait [#allocation3], 2048  }
  0x12   :  { %715 = vsyncadd [#allocation3], 4294965248  ;;  %v743_v0 = vld [vmem:[#allocation2 + $0x10] sm:$0xff]  ;;  %v745_v1 = vld [vmem:[#allocation2] sm:$0xff]  ;;  %s719_s20 = smov 127   ;;  %s720_s0 = smov 126  }
  0x13   :  { %74 = vrot.lane.b32.xlu1 %v743_v0, %s719_s20  ;;  %70 = vrot.lane.b32.xlu0 %v745_v1, %s719_s20  ;;  %v751_v2 = vld [vmem:[#allocation2 + $0x18] sm:$0xff]  ;;  %v753_v3 = vld [vmem:[#allocation2 + $0x8] sm:$0xff]  ;;  %v761_v5 = vld [vmem:[#allocation2 + $0x20] sm:$0xff]  ;;  %v813_v17 = vmul.f32 %v745_v1, %v745_v1  ;;  %v825_v19 = vmul.f32 %v743_v0, %v743_v0  ;;  %vm358_vm0 = vcmask 1046528   ;;  %vm487_vm1 = vcmask 1045504  }
  0x14   :  { %v759_v4 = vld [vmem:[#allocation2 + $0x28] sm:$0xff]  ;;  %v767_v6 = vld [vmem:[#allocation2 + $0x38] sm:$0xff]  ;;  %v769_v7 = vld [vmem:[#allocation2 + $0x30] sm:$0xff]  ;;  %v809_v16 = vmul.f32 %v753_v3, %v753_v3  ;;  %v821_v18 = vmul.f32 %v751_v2, %v751_v2  ;;  %v837_v21 = vmul.f32 %v761_v5, %v761_v5  ;;  %vm666_vm2 = vcmask 111616  }
  0x15   :  { %v775_v8 = vld [vmem:[#allocation2 + $0x48] sm:$0xff]  ;;  %v777_v9 = vld [vmem:[#allocation2 + $0x40] sm:$0xff]  ;;  %v783_v10 = vld [vmem:[#allocation2 + $0x58] sm:$0xff]  ;;  %v833_v20 = vmul.f32 %v759_v4, %v759_v4  ;;  %v845_v22 = vmul.f32 %v767_v6, %v767_v6  ;;  %v849_v23 = vmul.f32 %v769_v7, %v769_v7  ;;  %vm664_vm3 = vcmask 113664  }
  0x16   :  { %v785_v11 = vld [vmem:[#allocation2 + $0x50] sm:$0xff]  ;;  %v791_v12 = vld [vmem:[#allocation2 + $0x68] sm:$0xff]  ;;  %v793_v13 = vld [vmem:[#allocation2 + $0x60] sm:$0xff]  ;;  %v857_v24 = vmul.f32 %v775_v8, %v775_v8  ;;  %v861_v25 = vmul.f32 %v777_v9, %v777_v9  ;;  %v869_v26 = vmul.f32 %v783_v10, %v783_v10 }
  0x17   :  { %76 = vrot.lane.b32.xlu1 %v751_v2, %s719_s20  ;;  %72 = vrot.lane.b32.xlu0 %v753_v3, %s719_s20  ;;  %v799_v14 = vld [vmem:[#allocation2 + $0x78] sm:$0xff]  ;;  %v801_v15 = vld [vmem:[#allocation2 + $0x70] sm:$0xff]  ;;  %v873_v27 = vmul.f32 %v785_v11, %v785_v11  ;;  %v881_v28 = vmul.f32 %v791_v12, %v791_v12  ;;  %v885_v29 = vmul.f32 %v793_v13, %v793_v13 }
  0x18   :  { %v893_v30 = vmul.f32 %v799_v14, %v799_v14  ;;  %v897_v31 = vmul.f32 %v801_v15, %v801_v15 }
  0x19   :  { %1242 = vst [vmem:[#allocation5_spill] sm:$0xff] %v873_v27  ;;  %1243 = vst [vmem:[#allocation6_spill] sm:$0xff] %v881_v28 }
  0x1a   :  { %1244 = vst [vmem:[#allocation7_spill] sm:$0xff] %v885_v29  ;;  %1245 = vst [vmem:[#allocation8_spill] sm:$0xff] %v893_v30 }
  0x1b   :  { %80 = vrot.lane.b32.xlu1 %v759_v4, %s719_s20  ;;  %78 = vrot.lane.b32.xlu0 %v761_v5, %s719_s20  ;;  %1246 = vst [vmem:[#allocation9_spill] sm:$0xff] %v897_v31 }
  0x1f   :  { %84 = vrot.lane.b32.xlu1 %v767_v6, %s719_s20  ;;  %82 = vrot.lane.b32.xlu0 %v769_v7, %s719_s20 }
  0x23   :  { %88 = vrot.lane.b32.xlu1 %v775_v8, %s719_s20  ;;  %86 = vrot.lane.b32.xlu0 %v777_v9, %s719_s20 }
  0x27   :  { %92 = vrot.lane.b32.xlu1 %v783_v10, %s719_s20  ;;  %90 = vrot.lane.b32.xlu0 %v785_v11, %s719_s20 }
  0x2b   :  { %96 = vrot.lane.b32.xlu1 %v791_v12, %s719_s20  ;;  %94 = vrot.lane.b32.xlu0 %v793_v13, %s719_s20 }
  0x2f   :  { %100 = vrot.lane.b32.xlu1 %v799_v14, %s719_s20  ;;  %98 = vrot.lane.b32.xlu0 %v801_v15, %s719_s20 }
  0x33   :  { %152 = vrot.lane.b32.xlu1 %v809_v16, %s719_s20  ;;  %150 = vrot.lane.b32.xlu0 %v813_v17, %s719_s20 }
  0x37   :  { %156 = vrot.lane.b32.xlu1 %v821_v18, %s719_s20  ;;  %154 = vrot.lane.b32.xlu0 %v825_v19, %s719_s20 }
  0x3b   :  { %160 = vrot.lane.b32.xlu1 %v833_v20, %s719_s20  ;;  %158 = vrot.lane.b32.xlu0 %v837_v21, %s719_s20 }
  0x3f   :  { %164 = vrot.lane.b32.xlu1 %v845_v22, %s719_s20  ;;  %162 = vrot.lane.b32.xlu0 %v849_v23, %s719_s20 }
  0x43   :  { %168 = vrot.lane.b32.xlu1 %v857_v24, %s719_s20  ;;  %166 = vrot.lane.b32.xlu0 %v861_v25, %s719_s20 }
  0x47   :  { %172 = vrot.lane.b32.xlu1 %v869_v26, %s719_s20  ;;  %170 = vrot.lane.b32.xlu0 %v873_v27, %s719_s20 }
  0x4b   :  { %176 = vrot.lane.b32.xlu1 %v881_v28, %s719_s20  ;;  %174 = vrot.lane.b32.xlu0 %v885_v29, %s719_s20 }
  0x4f   :  { %180 = vrot.lane.b32.xlu1 %v893_v30, %s719_s20  ;;  %178 = vrot.lane.b32.xlu0 %v897_v31, %s719_s20 }
  0x53   :  { %216 = vrot.lane.b32.xlu1 %v753_v3, %s720_s0  ;;  %214 = vrot.lane.b32.xlu0 %v745_v1, %s720_s0 }
  0x57   :  { %220 = vrot.lane.b32.xlu1 %v751_v2, %s720_s0  ;;  %218 = vrot.lane.b32.xlu0 %v743_v0, %s720_s0 }
  0x5b   :  { %224 = vrot.lane.b32.xlu1 %v759_v4, %s720_s0  ;;  %222 = vrot.lane.b32.xlu0 %v761_v5, %s720_s0 }
  0x5f   :  { %228 = vrot.lane.b32.xlu1 %v767_v6, %s720_s0  ;;  %226 = vrot.lane.b32.xlu0 %v769_v7, %s720_s0 }
  0x63   :  { %232 = vrot.lane.b32.xlu1 %v775_v8, %s720_s0  ;;  %230 = vrot.lane.b32.xlu0 %v777_v9, %s720_s0 }
  0x67   :  { %236 = vrot.lane.b32.xlu1 %v783_v10, %s720_s0  ;;  %234 = vrot.lane.b32.xlu0 %v785_v11, %s720_s0 }
  0x6b   :  { %240 = vrot.lane.b32.xlu1 %v791_v12, %s720_s0  ;;  %238 = vrot.lane.b32.xlu0 %v793_v13, %s720_s0 }
  0x6f   :  { %244 = vrot.lane.b32.xlu1 %v799_v14, %s720_s0  ;;  %242 = vrot.lane.b32.xlu0 %v801_v15, %s720_s0 }
  0x73   :  { %280 = vrot.lane.b32.xlu1 %v809_v16, %s720_s0  ;;  %278 = vrot.lane.b32.xlu0 %v813_v17, %s720_s0 }
  0x77   :  { %284 = vrot.lane.b32.xlu1 %v821_v18, %s720_s0  ;;  %282 = vrot.lane.b32.xlu0 %v825_v19, %s720_s0 }
  0x7b   :  { %288 = vrot.lane.b32.xlu1 %v833_v20, %s720_s0  ;;  %286 = vrot.lane.b32.xlu0 %v837_v21, %s720_s0 }
  0x7f   :  { %292 = vrot.lane.b32.xlu1 %v845_v22, %s720_s0  ;;  %290 = vrot.lane.b32.xlu0 %v849_v23, %s720_s0 }
  0x83   :  { %296 = vrot.lane.b32.xlu1 %v857_v24, %s720_s0  ;;  %294 = vrot.lane.b32.xlu0 %v861_v25, %s720_s0 }
  0x85   :  { %v75_v32 = vpop.permute.xlu1 %74  ;;  %v71_v33 = vpop.permute.xlu0 %70 }
  0x87   :  { %300 = vrot.lane.b32.xlu1 %v869_v26, %s720_s0  ;;  %298 = vrot.lane.b32.xlu0 %v873_v27, %s720_s0 }
  0x89   :  { %v77_v34 = vpop.permute.xlu1 %76  ;;  %v73_v35 = vpop.permute.xlu0 %72 }
  0x8b   :  { %304 = vrot.lane.b32.xlu1 %v881_v28, %s720_s0  ;;  %302 = vrot.lane.b32.xlu0 %v885_v29, %s720_s0  ;;  %v121_v29 = vadd.f32 %v77_v34, %v751_v2  ;;  %v119_v28 = vadd.f32 %v73_v35, %v753_v3 }
  0x8d   :  { %v81_v36 = vpop.permute.xlu1 %80  ;;  %v79_v37 = vpop.permute.xlu0 %78 }
  0x8e   :  { %v123_v27 = vadd.f32 %v81_v36, %v759_v4 }
  0x8f   :  { %308 = vrot.lane.b32.xlu1 %v893_v30, %s720_s0  ;;  %306 = vrot.lane.b32.xlu0 %v897_v31, %s720_s0  ;;  %v120_v31 = vadd.f32 %v75_v32, %v743_v0  ;;  %v118_v30 = vadd.f32 %v71_v33, %v745_v1 }
  0x91   :  { %v85_v38 = vpop.permute.xlu1 %84  ;;  %v83_v39 = vpop.permute.xlu0 %82 }
  0x95   :  { %v89_v40 = vpop.permute.xlu1 %88  ;;  %v87_v41 = vpop.permute.xlu0 %86 }
  0x96   :  { %v988_v0 = vadd.f32 %v89_v40, %v775_v8  ;;  %v991_v1 = vadd.f32 %v87_v41, %v777_v9 }
  0x99   :  { %v93_v42 = vpop.permute.xlu1 %92  ;;  %v91_v43 = vpop.permute.xlu0 %90 }
  0x9a   :  { %v994_v3 = vadd.f32 %v93_v42, %v783_v10  ;;  %v997_v4 = vadd.f32 %v91_v43, %v785_v11 }
  0x9d   :  { %v97_v44 = vpop.permute.xlu1 %96  ;;  %v95_v45 = vpop.permute.xlu0 %94 }
  0x9e   :  { %v1000_v33 = vadd.f32 %v97_v44, %v791_v12 }
  0xa1   :  { %v101_v46 = vpop.permute.xlu1 %100  ;;  %v99_v47 = vpop.permute.xlu0 %98 }
  0xa2   :  { %v1006_v8 = vadd.f32 %v101_v46, %v799_v14  ;;  %v1009_v9 = vadd.f32 %v99_v47, %v801_v15 }
  0xa5   :  { %v153_v48 = vpop.permute.xlu1 %152  ;;  %v151_v49 = vpop.permute.xlu0 %150 }
  0xa6   :  { %v1012_v11 = vadd.f32 %v153_v48, %v809_v16 }
  0xa9   :  { %v157_v50 = vpop.permute.xlu1 %156  ;;  %v155_v51 = vpop.permute.xlu0 %154 }
  0xaa   :  { %v1018_v12 = vadd.f32 %v157_v50, %v821_v18 }
  0xad   :  { %v161_v52 = vpop.permute.xlu1 %160  ;;  %v159_v53 = vpop.permute.xlu0 %158 }
  0xae   :  { %v1024_v15 = vadd.f32 %v161_v52, %v833_v20  ;;  %v1251_v52 = vld [vmem:[#allocation6_spill] sm:$0xff] }
  0xb1   :  { %v165_v54 = vpop.permute.xlu1 %164  ;;  %v163_v55 = vpop.permute.xlu0 %162 }
  0xb5   :  { %v169_v56 = vpop.permute.xlu1 %168  ;;  %v167_v57 = vpop.permute.xlu0 %166 }
  0xb6   :  { %v1038_v43 = vadd.f32 %v169_v56, %v857_v24  ;;  %v1041_v47 = vadd.f32 %v167_v57, %v861_v25  ;;  %v1253_v57 = vld [vmem:[#allocation7_spill] sm:$0xff] }
  0xb9   :  { %v173_v58 = vpop.permute.xlu1 %172  ;;  %v171_v59 = vpop.permute.xlu0 %170 }
  0xbd   :  { %v967_v60 = vpop.permute.xlu1 %176  ;;  %v969_v61 = vpop.permute.xlu0 %174 }
  0xbe   :  { %1247 = vst [vmem:[#allocation10_spill] sm:$0xff] %v967_v60  ;;  %1248 = vst [vmem:[#allocation11_spill] sm:$0xff] %v969_v61  ;;  %v122_v60 = vadd.f32 %v79_v37, %v761_v5  ;;  %v982_v61 = vadd.f32 %v85_v38, %v767_v6 }
  0xc1   :  { %v971_v62 = vpop.permute.xlu1 %180  ;;  %v973_v63 = vpop.permute.xlu0 %178 }
  0xc2   :  { %1249 = vst [vmem:[#allocation12_spill] sm:$0xff] %v971_v62  ;;  %v985_v62 = vadd.f32 %v83_v39, %v769_v7  ;;  %v1003_v7 = vadd.f32 %v95_v45, %v793_v13  ;;  %v1021_v13 = vadd.f32 %v155_v51, %v825_v19  ;;  %v1029_v39 = vadd.f32 %v159_v53, %v837_v21 }
  0xc3   :  { %v1035_v19 = vadd.f32 %v163_v55, %v849_v23  ;;  %v1044_v23 = vadd.f32 %v173_v58, %v869_v26 }
  0xc5   :  { %v217_v32 = vpop.permute.xlu1 %216  ;;  %v215_v2 = vpop.permute.xlu0 %214  ;;  %v1252_v53 = vld [vmem:[#allocation10_spill] sm:$0xff] }
  0xc6   :  { %v263_v5 = vadd.f32 %v217_v32, %v119_v28  ;;  %v262_v6 = vadd.f32 %v215_v2, %v118_v30  ;;  %v1015_v28 = vadd.f32 %v151_v49, %v813_v17  ;;  %v1032_v17 = vadd.f32 %v165_v54, %v845_v22  ;;  %v1250_v49 = vld [vmem:[#allocation5_spill] sm:$0xff] }
  0xc7   :  { %v1047_v50 = vadd.f32 %v171_v59, %v1250_v49  ;;  %v1053_v54 = vadd.f32 %v1252_v53, %v1251_v52 }
  0xc8   :  { %v360_v34 = vrot.slane %v263_v5, 1  ;;  %v489_v10 = vrot.slane %v263_v5, 2  ;;  %v359_v35 = vrot.slane %v262_v6, 1  ;;  %v488_v36 = vrot.slane %v262_v6, 2 }
  0xc9   :  { %v221_v14 = vpop.permute.xlu1 %220  ;;  %v219_v30 = vpop.permute.xlu0 %218 }
  0xca   :  { %v361_v37 = vsel %vm358_vm0, %v359_v35, %v360_v34  ;;  %v490_v38 = vsel %vm487_vm1, %v488_v36, %v489_v10  ;;  %v265_v16 = vadd.f32 %v221_v14, %v121_v29  ;;  %v264_v40 = vadd.f32 %v219_v30, %v120_v31  ;;  %v1255_v36 = vld [vmem:[#allocation8_spill] sm:$0xff] }
  0xcb   :  { %v399_v18 = vadd.f32 %v361_v37, %v262_v6  ;;  %v400_v41 = vadd.f32 %v360_v34, %v263_v5  ;;  %v1256_v14 = vld [vmem:[#allocation12_spill] sm:$0xff] }
  0xcc   :  { %v363_v42 = vrot.slane %v265_v16, 1  ;;  %v492_v20 = vrot.slane %v265_v16, 2  ;;  %v362_v45 = vrot.slane %v264_v40, 1  ;;  %v491_v29 = vrot.slane %v264_v40, 2 }
  0xcd   :  { %v528_v44 = vadd.f32 %v490_v38, %v399_v18  ;;  %v225_v46 = vpop.permute.xlu1 %224  ;;  %v223_v21 = vpop.permute.xlu0 %222  ;;  %v529_v55 = vadd.f32 %v489_v10, %v400_v41  ;;  %v1062_v30 = vadd.f32 %v1256_v14, %v1255_v36 }
  0xce   :  { %v402_v22 = vadd.f32 %v363_v42, %v265_v16  ;;  %v267_v48 = vadd.f32 %v225_v46, %v123_v27  ;;  %v266_v31 = vadd.f32 %v223_v21, %v122_v60  ;;  %v364_v24 = vsel %vm358_vm0, %v362_v45, %v363_v42  ;;  %v1254_v27 = vld [vmem:[#allocation11_spill] sm:$0xff]  ;;  %v1257_v16 = vld [vmem:[#allocation9_spill] sm:$0xff] }
  0xcf   :  { %v493_v51 = vsel %vm487_vm1, %v491_v29, %v492_v20  ;;  %v401_v25 = vadd.f32 %v364_v24, %v264_v40  ;;  %v1057_v60 = vadd.f32 %v1254_v27, %v1253_v57  ;;  %v1069_v18 = vadd.f32 %v973_v63, %v1257_v16 }
  0xd0   :  { %v366_v56 = vrot.slane %v267_v48, 1  ;;  %v495_v26 = vrot.slane %v267_v48, 2  ;;  %v365_v58 = vrot.slane %v266_v31, 1  ;;  %v494_v32 = vrot.slane %v266_v31, 2 }
  0xd1   :  { %v229_v59 = vpop.permute.xlu1 %228  ;;  %v227_v2 = vpop.permute.xlu0 %226  ;;  %v531_v5 = vadd.f32 %v492_v20, %v402_v22  ;;  %v530_v6 = vadd.f32 %v493_v51, %v401_v25  ;;  %v601_v40 = vmul.f32 0.11111111, %v529_v55  ;;  %v600_v41 = vmul.f32 0.11111111, %v528_v44 }
  0xd2   :  { %v404_v34 = vadd.f32 %v366_v56, %v267_v48  ;;  %v269_v35 = vadd.f32 %v229_v59, %v982_v61  ;;  %v367_v10 = vsel %vm358_vm0, %v365_v58, %v366_v56  ;;  %v496_v37 = vsel %vm487_vm1, %v494_v32, %v495_v26 }
  0xd3   :  { %v268_v38 = vadd.f32 %v227_v2, %v985_v62  ;;  %v403_v42 = vadd.f32 %v367_v10, %v266_v31  ;;  %v603_v22 = vmul.f32 0.11111111, %v531_v5  ;;  %v1075_v44 = vmul.f32 %v601_v40, %v601_v40 }
  0xd4   :  { %v369_v20 = vrot.slane %v269_v35, 1  ;;  %v498_v45 = vrot.slane %v269_v35, 2  ;;  %v533_v48 = vadd.f32 %v495_v26, %v404_v34  ;;  %v1077_v31 = vmul.f32 %v600_v41, %v600_v41 }
  0xd5   :  { %v368_v61 = vrot.slane %v268_v38, 1  ;;  %v497_v29 = vrot.slane %v268_v38, 2  ;;  %v233_v46 = vpop.permute.xlu1 %232  ;;  %v231_v21 = vpop.permute.xlu0 %230  ;;  %v532_v49 = vadd.f32 %v496_v37, %v403_v42  ;;  %v602_v25 = vmul.f32 0.11111111, %v530_v6 }
  0xd6   :  { %v271_v24 = vadd.f32 %v233_v46, %v988_v0  ;;  %v406_v51 = vadd.f32 %v369_v20, %v269_v35  ;;  %v270_v52 = vadd.f32 %v231_v21, %v991_v1  ;;  %v605_v0 = vmul.f32 0.11111111, %v533_v48 }
  0xd7   :  { %v370_v62 = vsel %vm358_vm0, %v368_v61, %v369_v20  ;;  %v499_v63 = vsel %vm487_vm1, %v497_v29, %v498_v45  ;;  %v1080_v5 = vmul.f32 %v603_v22, %v603_v22  ;;  %v604_v36 = vmul.f32 0.11111111, %v532_v49 }
  0xd8   :  { %v405_v53 = vadd.f32 %v370_v62, %v268_v38  ;;  %v372_v55 = vrot.slane %v271_v24, 1  ;;  %v501_v56 = vrot.slane %v271_v24, 2  ;;  %v371_v57 = vrot.slane %v270_v52, 1 }
  0xd9   :  { %v500_v27 = vrot.slane %v270_v52, 2  ;;  %v237_v26 = vpop.permute.xlu1 %236  ;;  %v235_v58 = vpop.permute.xlu0 %234  ;;  %v535_v32 = vadd.f32 %v498_v45, %v406_v51  ;;  %v1085_v37 = vmul.f32 %v602_v25, %v602_v25  ;;  %v1093_v22 = vmul.f32 %v604_v36, %v604_v36 }
  0xda   :  { %v534_v59 = vadd.f32 %v499_v63, %v405_v53  ;;  %v273_v2 = vadd.f32 %v237_v26, %v994_v3  ;;  %v373_v1 = vsel %vm358_vm0, %v371_v57, %v372_v55  ;;  %v272_v35 = vadd.f32 %v235_v58, %v997_v4 }
  0xdb   :  { %v502_v34 = vsel %vm487_vm1, %v500_v27, %v501_v56  ;;  %v408_v6 = vadd.f32 %v372_v55, %v271_v24  ;;  %v407_v14 = vadd.f32 %v373_v1, %v270_v52  ;;  %v1087_v3 = vmul.f32 %v605_v0, %v605_v0 }
  0xdc   :  { %v375_v10 = vrot.slane %v273_v2, 1  ;;  %v504_v38 = vrot.slane %v273_v2, 2  ;;  %v374_v16 = vrot.slane %v272_v35, 1  ;;  %v503_v40 = vrot.slane %v272_v35, 2 }
  0xdd   :  { %v241_v41 = vpop.permute.xlu1 %240  ;;  %v239_v42 = vpop.permute.xlu0 %238  ;;  %v607_v20 = vmul.f32 0.11111111, %v535_v32  ;;  %v536_v45 = vadd.f32 %v502_v34, %v407_v14  ;;  %v537_v48 = vadd.f32 %v501_v56, %v408_v6  ;;  %v606_v57 = vmul.f32 0.11111111, %v534_v59 }
  0xde   :  { %v410_v61 = vadd.f32 %v375_v10, %v273_v2  ;;  %v376_v29 = vsel %vm358_vm0, %v374_v16, %v375_v10  ;;  %v505_v4 = vsel %vm487_vm1, %v503_v40, %v504_v38  ;;  %v275_v46 = vadd.f32 %v241_v41, %v1000_v33 }
  0xdf   :  { %v274_v21 = vadd.f32 %v239_v42, %v1003_v7  ;;  %v409_v24 = vadd.f32 %v376_v29, %v272_v35  ;;  %v1095_v25 = vmul.f32 %v607_v20, %v607_v20  ;;  %v609_v0 = vmul.f32 0.11111111, %v537_v48 }
  0xe0   :  { %v539_v49 = vadd.f32 %v504_v38, %v410_v61  ;;  %v378_v51 = vrot.slane %v275_v46, 1  ;;  %v507_v62 = vrot.slane %v275_v46, 2  ;;  %v608_v32 = vmul.f32 0.11111111, %v536_v45 }
  0xe1   :  { %v377_v63 = vrot.slane %v274_v21, 1  ;;  %v506_v52 = vrot.slane %v274_v21, 2  ;;  %v245_v53 = vpop.permute.xlu1 %244  ;;  %v243_v55 = vpop.permute.xlu0 %242  ;;  %v538_v27 = vadd.f32 %v505_v4, %v409_v24  ;;  %v1101_v10 = vmul.f32 %v606_v57, %v606_v57 }
  0xe2   :  { %v277_v26 = vadd.f32 %v245_v53, %v1006_v8  ;;  %v412_v33 = vadd.f32 %v378_v51, %v275_v46  ;;  %v276_v56 = vadd.f32 %v243_v55, %v1009_v9  ;;  %v611_v34 = vmul.f32 0.11111111, %v539_v49 }
  0xe3   :  { %v379_v7 = vsel %vm358_vm0, %v377_v63, %v378_v51  ;;  %v508_v58 = vsel %vm487_vm1, %v506_v52, %v507_v62  ;;  %v610_v8 = vmul.f32 0.11111111, %v538_v27  ;;  %v1107_v20 = vmul.f32 %v609_v0, %v609_v0 }
  0xe4   :  { %v411_v2 = vadd.f32 %v379_v7, %v274_v21  ;;  %v381_v1 = vrot.slane %v277_v26, 1  ;;  %v510_v35 = vrot.slane %v277_v26, 2  ;;  %v380_v36 = vrot.slane %v276_v56, 1 }
  0xe5   :  { %v509_v6 = vrot.slane %v276_v56, 2  ;;  %v281_v14 = vpop.permute.xlu1 %280  ;;  %v279_v59 = vpop.permute.xlu0 %278  ;;  %v541_v40 = vadd.f32 %v507_v62, %v412_v33  ;;  %v1109_v45 = vmul.f32 %v608_v32, %v608_v32  ;;  %v1111_v4 = vmul.f32 %v611_v34, %v611_v34 }
  0xe6   :  { %v540_v38 = vadd.f32 %v508_v58, %v411_v2  ;;  %v327_v16 = vadd.f32 %v281_v14, %v1012_v11  ;;  %v382_v41 = vsel %vm358_vm0, %v380_v36, %v381_v1  ;;  %v326_v42 = vadd.f32 %v279_v59, %v1015_v28 }
  0xe7   :  { %v511_v9 = vsel %vm487_vm1, %v509_v6, %v510_v35  ;;  %v413_v61 = vadd.f32 %v382_v41, %v276_v56  ;;  %v1113_v24 = vmul.f32 %v610_v8, %v610_v8  ;;  %v414_v51 = vadd.f32 %v381_v1, %v277_v26 }
  0xe8   :  { %v432_v29 = vrot.slane %v327_v16, 1  ;;  %v545_v46 = vrot.slane %v327_v16, 2  ;;  %v431_v21 = vrot.slane %v326_v42, 1  ;;  %v544_v11 = vrot.slane %v326_v42, 2 }
  0xe9   :  { %v285_v48 = vpop.permute.xlu1 %284  ;;  %v283_v49 = vpop.permute.xlu0 %282  ;;  %v1115_v62 = vadd.f32 %v511_v9, %v413_v61  ;;  %v1117_v63 = vmul.f32 0.11111111, %v541_v40  ;;  %v1122_v57 = vmul.f32 0.11111111, %v540_v38  ;;  %v1125_v1 = vadd.f32 %v510_v35, %v414_v51 }
  0xea   :  { %v472_v28 = vadd.f32 %v432_v29, %v327_v16  ;;  %v433_v52 = vsel %vm358_vm0, %v431_v21, %v432_v29  ;;  %v329_v53 = vadd.f32 %v285_v48, %v1018_v12  ;;  %v328_v55 = vadd.f32 %v283_v49, %v1021_v13 }
  0xeb   :  { %v471_v33 = vadd.f32 %v433_v52, %v326_v42  ;;  %v546_v7 = vsel %vm487_vm1, %v544_v11, %v545_v46 }
  0xec   :  { %v585_v27 = vadd.f32 %v545_v46, %v472_v28  ;;  %v435_v58 = vrot.slane %v329_v53, 1  ;;  %v548_v56 = vrot.slane %v329_v53, 2  ;;  %v434_v26 = vrot.slane %v328_v55, 1 }
  0xed   :  { %v547_v0 = vrot.slane %v328_v55, 2  ;;  %v289_v32 = vpop.permute.xlu1 %288  ;;  %v287_v2 = vpop.permute.xlu0 %286  ;;  %v584_v36 = vadd.f32 %v546_v7, %v471_v33 }
  0xee   :  { %v617_v34 = vmul.f32 0.11111111, %v585_v27  ;;  %v331_v12 = vadd.f32 %v289_v32, %v1024_v15  ;;  %v474_v6 = vadd.f32 %v435_v58, %v329_v53  ;;  %v436_v13 = vsel %vm358_vm0, %v434_v26, %v435_v58 }
  0xef   :  { %v549_v14 = vsel %vm487_vm1, %v547_v0, %v548_v56  ;;  %v330_v59 = vadd.f32 %v287_v2, %v1029_v39  ;;  %v616_v38 = vmul.f32 0.11111111, %v584_v36  ;;  %v473_v16 = vadd.f32 %v436_v13, %v328_v55 }
  0xf0   :  { %v649_v8 = vsub.f32 %v617_v34, %v1075_v44  ;;  %v438_v40 = vrot.slane %v331_v12, 1  ;;  %v587_v41 = vadd.f32 %v548_v56, %v474_v6  ;;  %v551_v9 = vrot.slane %v331_v12, 2 }
  0xf1   :  { %v437_v35 = vrot.slane %v330_v59, 1  ;;  %v550_v42 = vrot.slane %v330_v59, 2  ;;  %v293_v61 = vpop.permute.xlu1 %292  ;;  %v291_v29 = vpop.permute.xlu0 %290  ;;  %v648_v15 = vsub.f32 %v616_v38, %v1077_v31  ;;  %v586_v46 = vadd.f32 %v549_v14, %v473_v16 }
  0xf2   :  { %667 = vst.msk [vmem:[%s1236_s1 + $0x8] sm:$0x3f] %vm666_vm2, %v649_v8  ;;  %v476_v39 = vadd.f32 %v438_v40, %v331_v12  ;;  %v333_v44 = vadd.f32 %v293_v61, %v1032_v17  ;;  %v619_v21 = vmul.f32 0.11111111, %v587_v41  ;;  %v332_v49 = vadd.f32 %v291_v29, %v1035_v19 }
  0xf3   :  { %v439_v11 = vsel %vm358_vm0, %v437_v35, %v438_v40  ;;  %v552_v48 = vsel %vm487_vm1, %v550_v42, %v551_v9  ;;  %665 = vst.msk [vmem:[%s1236_s1] sm:$0xff] %vm664_vm3, %v648_v15  ;;  %v618_v51 = vmul.f32 0.11111111, %v586_v46 }
  0xf4   :  { %v589_v28 = vadd.f32 %v551_v9, %v476_v39  ;;  %v475_v52 = vadd.f32 %v439_v11, %v330_v59  ;;  %v441_v31 = vrot.slane %v333_v44, 1  ;;  %v651_v53 = vsub.f32 %v619_v21, %v1080_v5 }
  0xf5   :  { %v554_v55 = vrot.slane %v333_v44, 2  ;;  %v440_v17 = vrot.slane %v332_v49, 1  ;;  %v553_v27 = vrot.slane %v332_v49, 2  ;;  %v297_v33 = vpop.permute.xlu1 %296  ;;  %v295_v7 = vpop.permute.xlu0 %294  ;;  %v650_v58 = vsub.f32 %v618_v51, %v1085_v37 }
  0xf6   :  { %v621_v56 = vmul.f32 0.11111111, %v589_v28  ;;  %v588_v19 = vadd.f32 %v552_v48, %v475_v52  ;;  %v478_v26 = vadd.f32 %v441_v31, %v333_v44  ;;  %669 = vst.msk [vmem:[%s1236_s1 + $0x18] sm:$0x3f] %vm666_vm2, %v651_v53  ;;  %v335_v5 = vadd.f32 %v297_v33, %v1038_v43 }
  0xf7   :  { %v442_v0 = vsel %vm358_vm0, %v440_v17, %v441_v31  ;;  %v555_v32 = vsel %vm487_vm1, %v553_v27, %v554_v55  ;;  %v334_v2 = vadd.f32 %v295_v7, %v1041_v47  ;;  %668 = vst.msk [vmem:[%s1236_s1 + $0x10] sm:$0xff] %vm664_vm3, %v650_v58 }
  0xf8   :  { %v653_v37 = vsub.f32 %v621_v56, %v1087_v3  ;;  %v620_v34 = vmul.f32 0.11111111, %v588_v19  ;;  %v591_v36 = vadd.f32 %v554_v55, %v478_v26  ;;  %v477_v12 = vadd.f32 %v442_v0, %v332_v49 }
  0xf9   :  { %v444_v6 = vrot.slane %v335_v5, 1  ;;  %v557_v13 = vrot.slane %v335_v5, 2  ;;  %v443_v14 = vrot.slane %v334_v2, 1  ;;  %v556_v59 = vrot.slane %v334_v2, 2  ;;  %v301_v8 = vpop.permute.xlu1 %300  ;;  %v299_v38 = vpop.permute.xlu0 %298 }
  0xfa   :  { %671 = vst.msk [vmem:[%s1236_s1 + $0x28] sm:$0x3f] %vm666_vm2, %v653_v37  ;;  %v652_v43 = vsub.f32 %v620_v34, %v1093_v22  ;;  %v623_v47 = vmul.f32 0.11111111, %v591_v36  ;;  %v590_v16 = vadd.f32 %v555_v32, %v477_v12  ;;  %v337_v3 = vadd.f32 %v301_v8, %v1044_v23 }
  0xfb   :  { %v480_v40 = vadd.f32 %v444_v6, %v335_v5  ;;  %v445_v41 = vsel %vm358_vm0, %v443_v14, %v444_v6  ;;  %v558_v9 = vsel %vm487_vm1, %v556_v59, %v557_v13  ;;  %v336_v35 = vadd.f32 %v299_v38, %v1047_v50 }
  0xfc   :  { %670 = vst.msk [vmem:[%s1236_s1 + $0x20] sm:$0xff] %vm664_vm3, %v652_v43  ;;  %v655_v42 = vsub.f32 %v623_v47, %v1095_v25  ;;  %v622_v61 = vmul.f32 0.11111111, %v590_v16  ;;  %v479_v22 = vadd.f32 %v445_v41, %v334_v2  ;;  %v447_v29 = vrot.slane %v337_v3, 1 }
  0xfd   :  { %v593_v15 = vadd.f32 %v557_v13, %v480_v40  ;;  %v560_v46 = vrot.slane %v337_v3, 2  ;;  %v446_v23 = vrot.slane %v336_v35, 1  ;;  %v559_v39 = vrot.slane %v336_v35, 2  ;;  %v305_v44 = vpop.permute.xlu1 %304  ;;  %v303_v21 = vpop.permute.xlu0 %302 }
  0xfe   :  { %673 = vst.msk [vmem:[%s1236_s1 + $0x38] sm:$0x3f] %vm666_vm2, %v655_v42  ;;  %v654_v50 = vsub.f32 %v622_v61, %v1101_v10  ;;  %v592_v11 = vadd.f32 %v558_v9, %v479_v22  ;;  %v482_v48 = vadd.f32 %v447_v29, %v337_v3  ;;  %v339_v25 = vadd.f32 %v305_v44, %v1053_v54 }
  0xff   :  { %v625_v49 = vmul.f32 0.11111111, %v593_v15  ;;  %v448_v51 = vsel %vm358_vm0, %v446_v23, %v447_v29  ;;  %v561_v28 = vsel %vm487_vm1, %v559_v39, %v560_v46  ;;  %v338_v52 = vadd.f32 %v303_v21, %v1057_v60 }
 0x100   :  { %672 = vst.msk [vmem:[%s1236_s1 + $0x30] sm:$0xff] %vm664_vm3, %v654_v50  ;;  %v624_v31 = vmul.f32 0.11111111, %v592_v11  ;;  %v595_v53 = vadd.f32 %v560_v46, %v482_v48  ;;  %v481_v55 = vadd.f32 %v448_v51, %v336_v35  ;;  %v450_v10 = vrot.slane %v339_v25, 1 }
 0x101   :  { %v657_v17 = vsub.f32 %v625_v49, %v1107_v20  ;;  %v563_v27 = vrot.slane %v339_v25, 2  ;;  %v449_v54 = vrot.slane %v338_v52, 1  ;;  %v562_v33 = vrot.slane %v338_v52, 2  ;;  %v309_v7 = vpop.permute.xlu1 %308  ;;  %v307_v58 = vpop.permute.xlu0 %306 }
 0x102   :  { %v656_v56 = vsub.f32 %v624_v31, %v1109_v45  ;;  %v627_v19 = vmul.f32 0.11111111, %v595_v53  ;;  %v594_v60 = vadd.f32 %v561_v28, %v481_v55  ;;  %v484_v26 = vadd.f32 %v450_v10, %v339_v25 }
 0x103   :  { %675 = vst.msk [vmem:[%s1236_s1 + $0x48] sm:$0x3f] %vm666_vm2, %v657_v17  ;;  %v451_v0 = vsel %vm358_vm0, %v449_v54, %v450_v10  ;;  %v564_v32 = vsel %vm487_vm1, %v562_v33, %v563_v27  ;;  %v341_v20 = vadd.f32 %v309_v7, %v1062_v30  ;;  %v340_v5 = vadd.f32 %v307_v58, %v1069_v18 }
 0x104   :  { %674 = vst.msk [vmem:[%s1236_s1 + $0x40] sm:$0xff] %vm664_vm3, %v656_v56  ;;  %v659_v45 = vsub.f32 %v627_v19, %v1111_v4  ;;  %v626_v2 = vmul.f32 0.11111111, %v594_v60  ;;  %v597_v37 = vadd.f32 %v563_v27, %v484_v26  ;;  %v483_v34 = vadd.f32 %v451_v0, %v338_v52 }
 0x105   :  { %v453_v36 = vrot.slane %v341_v20, 1  ;;  %v566_v12 = vrot.slane %v341_v20, 2  ;;  %v452_v6 = vrot.slane %v340_v5, 1  ;;  %v565_v13 = vrot.slane %v340_v5, 2 }
 0x106   :  { %v645_v14 = vmul.f32 %v1117_v63, %v1117_v63  ;;  %677 = vst.msk [vmem:[%s1236_s1 + $0x58] sm:$0x3f] %vm666_vm2, %v659_v45  ;;  %v658_v30 = vsub.f32 %v626_v2, %v1113_v24  ;;  %v629_v18 = vmul.f32 0.11111111, %v597_v37  ;;  %v596_v59 = vadd.f32 %v564_v32, %v483_v34 }
 0x107   :  { %v644_v4 = vmul.f32 %v1122_v57, %v1122_v57  ;;  %v615_v8 = vmul.f32 0.11111111, %v1125_v1  ;;  %v486_v38 = vadd.f32 %v453_v36, %v341_v20  ;;  %v454_v43 = vsel %vm358_vm0, %v452_v6, %v453_v36 }
 0x108   :  { %v614_v47 = vmul.f32 0.11111111, %v1115_v62  ;;  %676 = vst.msk [vmem:[%s1236_s1 + $0x50] sm:$0xff] %vm664_vm3, %v658_v30  ;;  %v661_v63 = vsub.f32 %v629_v18, %v645_v14  ;;  %v628_v16 = vmul.f32 0.11111111, %v596_v59  ;;  %v485_v24 = vadd.f32 %v454_v43, %v340_v5 }
 0x109   :  { %v599_v3 = vadd.f32 %v566_v12, %v486_v38  ;;  %v567_v40 = vsel %vm487_vm1, %v565_v13, %v566_v12  ;;  %v647_v41 = vmul.f32 %v615_v8, %v615_v8 }
 0x10a   :  { %679 = vst.msk [vmem:[%s1236_s1 + $0x68] sm:$0x3f] %vm666_vm2, %v661_v63  ;;  %v660_v57 = vsub.f32 %v628_v16, %v644_v4  ;;  %v598_v1 = vadd.f32 %v567_v40, %v485_v24  ;;  %v646_v9 = vmul.f32 %v614_v47, %v614_v47 }
 0x10b   :  { %v631_v62 = vmul.f32 0.11111111, %v599_v3 }
 0x10c   :  { %678 = vst.msk [vmem:[%s1236_s1 + $0x60] sm:$0xff] %vm664_vm3, %v660_v57  ;;  %v630_v35 = vmul.f32 0.11111111, %v598_v1 }
 0x10d   :  { %v663_v42 = vsub.f32 %v631_v62, %v647_v41 }
 0x10e   :  { %v662_v61 = vsub.f32 %v630_v35, %v646_v9 }
 0x10f   :  { %681 = vst.msk [vmem:[%s1236_s1 + $0x78] sm:$0x3f] %vm666_vm2, %v663_v42 }
 0x110   :  { %680 = vst.msk [vmem:[%s1236_s1 + $0x70] sm:$0xff] %vm664_vm3, %v662_v61 }
 0x111   :  { %686 = vsyncpa [#allocation3], 1 }

</bundles_post_ra>
